<compile_context>
chip_gen: v7x
topology: tpu7x:2x2x1
jax: 0.10.0
libtpu: 0.0.40
codegen_flags: <defaults>
</compile_context>

<pallas_src>
import functools
import math

import jax
import jax.numpy as jnp
from jax import lax
from jax.experimental import pallas as pl
from jax.experimental.pallas import tpu as pltpu

_BN_EPS = 1e-5


def _round_up(x, m):
    return (x + m - 1) // m * m


def _device_kind():
    try:
        return jax.devices()[0].device_kind.lower()
    except Exception:
        return ""


_KIND = _device_kind()
_IS_V6 = "v6" in _KIND
_IS_V7 = "v7" in _KIND


def _pick_tile(total, cap):
    # largest tile in {512, 384, 256, 128} that divides `total` (a multiple of 128)
    for t in (512, 384, 256, 128):
        if t <= cap and total % t == 0:
            return t
    return min(total, 128)


def _choose_tiles(m, npad, kp):
    mp = _round_up(m, 8)
    if mp <= 256:
        # Tiny-M late layers (layer3/4): collapse the grid with wide N/K tiles
        # so the kernel is not per-grid-step-overhead bound.
        return mp, mp, _pick_tile(npad, 512), _pick_tile(kp, 512)
    nk_cap = 512 if (_IS_V6 or _IS_V7) else 256
    tm = 512 if (_IS_V6 and mp % 512 == 0) else (256 if mp % 256 == 0 else 128)
    if mp % tm:
        tm = min(256, mp)
        mp = _round_up(mp, tm)
    return mp, tm, _pick_tile(npad, 512), _pick_tile(kp, nk_cap)


# ----------------------------------------------------------------------------
# Pallas kernels
# ----------------------------------------------------------------------------
def _mm_kernel(a_ref, b_ref, s_ref, c_ref, o_ref, acc_ref, *, relu):
    @pl.when(pl.program_id(2) == 0)
    def _():
        acc_ref[...] = jnp.zeros_like(acc_ref)

    acc_ref[...] += jnp.dot(a_ref[...], b_ref[...],
                            preferred_element_type=jnp.float32)

    @pl.when(pl.program_id(2) == pl.num_programs(2) - 1)
    def _():
        out = acc_ref[...] * s_ref[...] + c_ref[...]
        if relu:
            out = jnp.maximum(out, 0.0)
        o_ref[...] = out.astype(o_ref.dtype)


def _mm_res_kernel(a_ref, b_ref, s_ref, c_ref, r_ref, o_ref, acc_ref, *, relu):
    @pl.when(pl.program_id(2) == 0)
    def _():
        acc_ref[...] = jnp.zeros_like(acc_ref)

    acc_ref[...] += jnp.dot(a_ref[...], b_ref[...],
                            preferred_element_type=jnp.float32)

    @pl.when(pl.program_id(2) == pl.num_programs(2) - 1)
    def _():
        out = (acc_ref[...] * s_ref[...] + c_ref[...]
               + r_ref[...].astype(jnp.float32))
        if relu:
            out = jnp.maximum(out, 0.0)
        o_ref[...] = out.astype(o_ref.dtype)


def _maxpool3x3s2_kernel(x_ref, o_ref, *, ho):
    """3x3 stride-2 max-pool of one padded NHWC frame.

    x_ref: (1, hp, wp, C) with hp >= 2*ho + 2 (spatial -inf padding).
    o_ref: (1, ho, wp-2, C) -- all W columns; stride-2 decimation along W is a
    cheap strided slice done by the caller (avoids exotic in-kernel layouts).
    Only leading-dim reshapes / contiguous slices are used (layout-safe).
    """
    _, hp, wp, c = x_ref.shape
    a = x_ref[0, pl.ds(0, 2 * ho), :, :].reshape(ho, 2, wp, c)
    b = x_ref[0, pl.ds(2, 2 * ho), :, :].reshape(ho, 2, wp, c)
    # rows 2i, 2i+1, 2i+2  ->  H window max
    hm = jnp.maximum(jnp.maximum(a[:, 0], a[:, 1]), b[:, 0])          # (ho, wp, C)
    # 3-tap sliding max along W (decimated outside the kernel)
    o_ref[0] = jnp.maximum(jnp.maximum(hm[:, 0:wp - 2, :], hm[:, 1:wp - 1, :]),
                           hm[:, 2:wp, :])


def _tmax_kernel(x_ref, o_ref):
    o_ref[...] = jnp.max(x_ref[...], axis=1)


def _nl_kernel(x_ref, gw_ref, gb_ref, tw_ref, tb_ref, pw_ref, pb_ref,
               ww_ref, ws_ref, wb_ref, o_ref):
    """Fused stripe non-local block.

    x_ref: (b, n_tok, hh*w, C) bf16 -- n_tok = t(=2) * stripe, C on lanes.
    Weights: gw/tw/pw (C, inter) bf16, ww (inter, C) bf16; biases (1, inter)
    f32, W scale/bias (1, C) f32 (conv bias + BN3d folded).
    """
    b, n_tok, hhw, c = x_ref.shape
    inter = gw_ref.shape[1]

    x = x_ref[...]                                            # bf16
    # stripe-wise adaptive mean pool (reduce over the sublane-ish dim), f32
    d = jnp.mean(x.astype(jnp.float32), axis=2)               # (b, n, C)
    d2 = d.reshape(b * n_tok, c).astype(jnp.bfloat16)

    g = (jnp.dot(d2, gw_ref[...], preferred_element_type=jnp.float32)
         + gb_ref[...]).reshape(b, n_tok, inter)
    th = (jnp.dot(d2, tw_ref[...], preferred_element_type=jnp.float32)
          + tb_ref[...]).reshape(b, n_tok, inter)
    ph = (jnp.dot(d2, pw_ref[...], preferred_element_type=jnp.float32)
          + pb_ref[...]).reshape(b, n_tok, inter)

    # attention: softmax(theta @ phi^T, dim=-1) @ g
    f = jnp.einsum("bni,bmi->bnm", th, ph,
                   preferred_element_type=jnp.float32)        # (b, n, n)
    f = f - jnp.max(f, axis=-1, keepdims=True)
    e = jnp.exp(f)
    attn = e * pl.reciprocal(jnp.sum(e, axis=-1, keepdims=True), approx=True)
    y = jnp.einsum("bnm,bmi->bni", attn, g,
                   preferred_element_type=jnp.float32)        # (b, n, inter)

    # W: 1x1x1 conv3d (+bias) + BatchNorm3d, folded into scale/bias
    wy = jnp.dot(y.reshape(b * n_tok, inter).astype(jnp.bfloat16), ww_ref[...],
                 preferred_element_type=jnp.float32)
    wy = wy * ws_ref[...] + wb_ref[...]                       # (b*n, C)

    # repeat over (hh*w) and add the residual x
    o_ref[...] = (x.astype(jnp.float32)
                  + wy.reshape(b, n_tok, 1, c)).astype(o_ref.dtype)


# ----------------------------------------------------------------------------
# Pallas wrappers
# ----------------------------------------------------------------------------
def matmul_affine(a, w, scale, bias, residual=None, relu=False):
    """relu?((a @ w) * scale + bias [+ residual]) with bf16 MXU operands,
    f32 accumulation/epilogue, bf16 output.  `w`, `scale`, `bias` are already
    padded to 128-multiples (prepacked)."""
    m, ka = a.shape
    kp, npad = w.shape
    mp, tm, tn, tk = _choose_tiles(m, npad, kp)

    if mp != m or kp != ka:
        a = jnp.pad(a, ((0, mp - m), (0, kp - ka)))

    grid = (mp // tm, npad // tn, kp // tk)
    a_spec = pl.BlockSpec((tm, tk), lambda i, j, kk: (i, kk))
    b_spec = pl.BlockSpec((tk, tn), lambda i, j, kk: (kk, j))
    v_spec = pl.BlockSpec((1, tn), lambda i, j, kk: (0, j))
    o_spec = pl.BlockSpec((tm, tn), lambda i, j, kk: (i, j))
    r_spec = pl.BlockSpec((tm, tn), lambda i, j, kk: (i, j))

    cost = pl.CostEstimate(
        flops=2 * mp * npad * kp, transcendentals=0,
        bytes_accessed=int((mp * kp + kp * npad + 2 * mp * npad) * 2))
    cparams = pltpu.CompilerParams(
        dimension_semantics=("parallel", "parallel", "arbitrary"))

    if residual is None:
        out = pl.pallas_call(
            functools.partial(_mm_kernel, relu=relu),
            grid=grid,
            in_specs=[a_spec, b_spec, v_spec, v_spec],
            out_specs=o_spec,
            out_shape=jax.ShapeDtypeStruct((mp, npad), jnp.bfloat16),
            scratch_shapes=[pltpu.VMEM((tm, tn), jnp.float32)],
            compiler_params=cparams,
            cost_estimate=cost,
        )(a, w, scale, bias)
    else:
        r = residual
        if r.shape[0] != mp:
            r = jnp.pad(r, ((0, mp - r.shape[0]), (0, 0)))
        out = pl.pallas_call(
            functools.partial(_mm_res_kernel, relu=relu),
            grid=grid,
            in_specs=[a_spec, b_spec, v_spec, v_spec, r_spec],
            out_specs=o_spec,
            out_shape=jax.ShapeDtypeStruct((mp, npad), jnp.bfloat16),
            scratch_shapes=[pltpu.VMEM((tm, tn), jnp.float32)],
            compiler_params=cparams,
            cost_estimate=cost,
        )(a, w, scale, bias, r)
    return out if mp == m else out[:m]


def maxpool2d_3x3s2(x):
    """3x3/s2/p1 max-pool, NHWC bf16, C (multiple of 128) on lanes."""
    n, h, w, c = x.shape
    ho = (h - 1) // 2 + 1
    wo = (w - 1) // 2 + 1
    hp = 2 * ho + 2
    wp = 2 * wo + 2
    xp = jnp.pad(x, ((0, 0), (1, hp - h - 1), (1, wp - w - 1), (0, 0)),
                 constant_values=-jnp.inf)
    out = pl.pallas_call(
        functools.partial(_maxpool3x3s2_kernel, ho=ho),
        grid=(n,),
        in_specs=[pl.BlockSpec((1, hp, wp, c), lambda i: (i, 0, 0, 0))],
        out_specs=pl.BlockSpec((1, ho, wp - 2, c), lambda i: (i, 0, 0, 0)),
        out_shape=jax.ShapeDtypeStruct((n, ho, wp - 2, c), x.dtype),
        compiler_params=pltpu.CompilerParams(dimension_semantics=("parallel",)),
    )(xp)
    # stride-2 decimation along W (cheap strided slice on a tiny bf16 tensor)
    return out[:, :, 0:2 * wo:2, :]


def temporal_max_pairs(x):
    """x: (BT, H, W, C) NHWC -> max over consecutive frame pairs."""
    bt, h, w, c = x.shape
    g = bt // 2
    xg = x.reshape(g, 2, h * w, c)                     # pure metadata reshape
    out = pl.pallas_call(
        _tmax_kernel,
        grid=(g,),
        in_specs=[pl.BlockSpec((1, 2, h * w, c), lambda i: (i, 0, 0, 0))],
        out_specs=pl.BlockSpec((1, h * w, c), lambda i: (i, 0, 0)),
        out_shape=jax.ShapeDtypeStruct((g, h * w, c), x.dtype),
        compiler_params=pltpu.CompilerParams(dimension_semantics=("parallel",)),
    )(xg)
    return out.reshape(g, h, w, c)


# ----------------------------------------------------------------------------
# Convolution via NHWC bf16 im2col (glue) + Pallas matmul
# ----------------------------------------------------------------------------
def _im2col_nhwc(x, kh, kw, stride, pad):
    n, h, w, c = x.shape
    if pad > 0:
        x = jnp.pad(x, ((0, 0), (pad, pad), (pad, pad), (0, 0)))
    ho = (h + 2 * pad - kh) // stride + 1
    wo = (w + 2 * pad - kw) // stride + 1
    if kh == 1 and kw == 1:
        a = x[:, ::stride, ::stride, :] if stride > 1 else x
        return a.reshape(n * ho * wo, c), ho, wo
    cols = []
    for di in range(kh):
        for dj in range(kw):
            cols.append(x[:, di:di + (ho - 1) * stride + 1:stride,
                             dj:dj + (wo - 1) * stride + 1:stride, :])
    a = jnp.concatenate(cols, axis=-1)                 # (n, ho, wo, kh*kw*c) bf16
    return a.reshape(n * ho * wo, kh * kw * c), ho, wo


def conv_apply(x, pc, stride=1, pad=0, relu=False, residual=None):
    """conv2d (no bias) + BN(eval) [+ residual] [+ ReLU]; x NHWC bf16 with
    carried (128-padded) channels; returns bf16 with carried channels."""
    n = x.shape[0]
    a, ho, wo = _im2col_nhwc(x, pc["kh"], pc["kw"], stride, pad)
    res = None if residual is None else residual.reshape(-1, residual.shape[-1])
    out = matmul_affine(a, pc["w"], pc["scale"], pc["bias"],
                        residual=res, relu=relu)
    return out.reshape(n, ho, wo, pc["cout_pad"])


# ----------------------------------------------------------------------------
# Module forwards (Bottleneck / Stripe_NonLocalBlock / hr network)
# ----------------------------------------------------------------------------
def bottleneck_fwd(x, p):
    s = p["stride"]
    out = conv_apply(x, p["conv1"], stride=1, pad=0, relu=True)
    out = conv_apply(out, p["conv2"], stride=s, pad=1, relu=True)
    if "down" in p:
        residual = conv_apply(x, p["down"], stride=s, pad=0)
    else:
        residual = x
    out = conv_apply(out, p["conv3"], stride=1, pad=0, relu=True,
                     residual=residual)
    return out


def stripe_nonlocal_fwd(x, p):
    """x: (BT, H, W, C) bf16 frames; NL runs on pairs of consecutive frames."""
    bt, h, w, c = x.shape
    stripe = p["stripe"]
    hh = h // stripe
    assert stripe * hh == h
    b = bt // 2
    n_tok = 2 * stripe
    hhw = hh * w

    # (BT,H,W,C) -> (b, 2, stripe, hh, W, C) -> (b, n_tok, hh*W, C): pure reshape
    xg = x.reshape(b, n_tok, hhw, c)

    need = (2 * xg.size * 2
            + 2 * (p["g_w"].size + p["theta_w"].size
                   + p["phi_w"].size + p["W_w"].size)
            + 4 * (3 * p["inter"] + 2 * c))
    vmem_limit = min(int(need) + (10 << 20), 30 * 1024 * 1024)

    out = pl.pallas_call(
        _nl_kernel,
        out_shape=jax.ShapeDtypeStruct((b, n_tok, hhw, c), x.dtype),
        compiler_params=pltpu.CompilerParams(vmem_limit_bytes=vmem_limit),
    )(xg, p["g_w"], p["g_b"], p["theta_w"], p["theta_b"],
      p["phi_w"], p["phi_b"], p["W_w"], p["W_scale"], p["W_bias"])
    return out.reshape(bt, h, w, c)


def resnet_video_nonlocal_stripe_hr_fwd(packed, x):
    B, T, C, H, W = x.shape
    xf = x.reshape(B * T, C, H, W).transpose(0, 2, 3, 1).astype(jnp.bfloat16)
    # hr forward: conv1 -> bn1 -> maxpool (no ReLU, per the reference module)
    xf = conv_apply(xf, packed["conv1"], stride=2, pad=3, relu=False)
    xf = maxpool2d_3x3s2(xf)

    t_cur = T
    for li in range(4):
        blocks = packed["layers"][li]
        nls = packed["nl"][li]
        idxs = packed["nl_idx"][li] if packed["nl_idx"][li] else [-1]
        counter = 0
        for bi, bp in enumerate(blocks):
            xf = bottleneck_fwd(xf, bp)
            if counter < len(nls) and bi == idxs[counter]:
                xf = stripe_nonlocal_fwd(xf, nls[counter])
                counter += 1
        if li in (1, 2):
            # hr variant: temporal max over frame pairs after layer2 and layer3
            xf = temporal_max_pairs(xf)
            t_cur //= 2

    bt, h2, w2, c2 = xf.shape
    out = xf.reshape(B, t_cur, h2, w2, c2).transpose(0, 4, 1, 2, 3)
    return out.astype(jnp.float32)


# ----------------------------------------------------------------------------
# Parameter packing (done once, outside the per-forward path)
# ----------------------------------------------------------------------------
def _bn_fold(bn):
    scale = bn["gamma"] * lax.rsqrt(bn["var"] + _BN_EPS)
    bias = bn["beta"] - bn["mean"] * scale
    return scale, bias


def _pack_conv(w, bn, cin_carry):
    """w: (Cout, Cin, kh, kw).  Returns bf16 (kh*kw*cin_carry -> kp, npad)
    weight matrix + f32 (1, npad) scale/bias with zero padding (so carried
    padded channels stay exactly zero)."""
    cout, cin, kh, kw = w.shape
    if cin_carry > cin:
        w = jnp.pad(w, ((0, 0), (0, cin_carry - cin), (0, 0), (0, 0)))
    k = kh * kw * cin_carry
    kp = _round_up(k, 128)
    npad = _round_up(cout, 128)
    wm = w.transpose(2, 3, 1, 0).reshape(k, cout).astype(jnp.bfloat16)
    wm = jnp.pad(wm, ((0, kp - k), (0, npad - cout)))
    scale, bias = _bn_fold(bn)
    s = jnp.pad(scale, (0, npad - cout)).reshape(1, npad).astype(jnp.float32)
    b = jnp.pad(bias, (0, npad - cout)).reshape(1, npad).astype(jnp.float32)
    return dict(w=wm, scale=s, bias=b, kh=kh, kw=kw, cout_pad=npad)


def _pack_nl(p, cin_carry):
    in_c = p["g_w"].shape[1]
    inter = p["inter"]

    def pad_in_t(wmat):                      # (inter, in_c) -> (carry, inter) bf16
        if cin_carry > in_c:
            wmat = jnp.pad(wmat, ((0, 0), (0, cin_carry - in_c)))
        return wmat.T.astype(jnp.bfloat16)

    gw = pad_in_t(p["g_w"])
    tw = pad_in_t(p["theta_w"])
    pw = pad_in_t(p["phi_w"])
    ww = p["W_w"]                            # (in_c, inter)
    if cin_carry > in_c:
        ww = jnp.pad(ww, ((0, cin_carry - in_c), (0, 0)))
    ww_t = ww.T.astype(jnp.bfloat16)         # (inter, carry)

    bn = p["W_bn"]
    ws = bn["gamma"] * lax.rsqrt(bn["var"] + _BN_EPS)
    wb = p["W_b"] * ws + bn["beta"] - bn["mean"] * ws
    if cin_carry > in_c:
        ws = jnp.pad(ws, (0, cin_carry - in_c))
        wb = jnp.pad(wb, (0, cin_carry - in_c))

    return dict(
        stripe=p["stripe"], inter=inter,
        g_w=gw, g_b=p["g_b"].reshape(1, inter).astype(jnp.float32),
        theta_w=tw, theta_b=p["theta_b"].reshape(1, inter).astype(jnp.float32),
        phi_w=pw, phi_b=p["phi_b"].reshape(1, inter).astype(jnp.float32),
        W_w=ww_t,
        W_scale=ws.reshape(1, cin_carry).astype(jnp.float32),
        W_bias=wb.reshape(1, cin_carry).astype(jnp.float32),
    )


def prepare_params(params):
    packed = {"nl_idx": [list(v) for v in params["nl_idx"]]}
    carry = 3
    packed["conv1"] = _pack_conv(params["conv1_w"], params["bn1"], carry)
    carry = packed["conv1"]["cout_pad"]
    packed["layers"] = []
    packed["nl"] = []
    for li in range(4):
        blks = []
        for bp in params["layers"][li]:
            q = {"stride": bp["stride"]}
            q["conv1"] = _pack_conv(bp["conv1_w"], bp["bn1"], carry)
            mid = q["conv1"]["cout_pad"]
            q["conv2"] = _pack_conv(bp["conv2_w"], bp["bn2"], mid)
            q["conv3"] = _pack_conv(bp["conv3_w"], bp["bn3"],
                                    q["conv2"]["cout_pad"])
            if "down_w" in bp:
                q["down"] = _pack_conv(bp["down_w"], bp["down_bn"], carry)
            carry = q["conv3"]["cout_pad"]
            blks.append(q)
        packed["layers"].append(blks)
        packed["nl"].append(
            [_pack_nl(nlp, carry) for nlp in params["nl"][li]])
    return packed


# ----------------------------------------------------------------------------
# Deterministic parameter init (shapes from the PyTorch __init__)
# ----------------------------------------------------------------------------
class KeyGen:
    def __init__(self, key):
        self.key = key

    def __call__(self):
        self.key, k = jax.random.split(self.key)
        return k


def conv_init(key, shape):
    fan_in = math.prod(shape[1:])
    return jax.random.normal(key, shape, jnp.float32) * (2.0 / fan_in) ** 0.5


def bn_init(key, c):
    k1, k2, k3, k4 = jax.random.split(key, 4)
    return dict(
        gamma=1.0 + 0.1 * jax.random.normal(k1, (c,), jnp.float32),
        beta=0.1 * jax.random.normal(k2, (c,), jnp.float32),
        mean=0.1 * jax.random.normal(k3, (c,), jnp.float32),
        var=1.0 + 0.1 * jnp.abs(jax.random.normal(k4, (c,), jnp.float32)),
    )


def nl_init(key, stripe, in_c):
    inter = in_c // 2
    ks = KeyGen(key)
    return dict(
        stripe=stripe, inter=inter,
        g_w=conv_init(ks(), (inter, in_c, 1, 1, 1)).reshape(inter, in_c),
        g_b=0.1 * jax.random.normal(ks(), (inter,), jnp.float32),
        theta_w=conv_init(ks(), (inter, in_c, 1, 1, 1)).reshape(inter, in_c),
        theta_b=0.1 * jax.random.normal(ks(), (inter,), jnp.float32),
        phi_w=conv_init(ks(), (inter, in_c, 1, 1, 1)).reshape(inter, in_c),
        phi_b=0.1 * jax.random.normal(ks(), (inter,), jnp.float32),
        W_w=conv_init(ks(), (in_c, inter, 1, 1, 1)).reshape(in_c, inter),
        W_b=0.1 * jax.random.normal(ks(), (in_c,), jnp.float32),
        # module init: nn.init.constant_(W[1].weight, 0), constant_(W[1].bias, 0)
        W_bn=dict(gamma=jnp.zeros((in_c,), jnp.float32),
                  beta=jnp.zeros((in_c,), jnp.float32),
                  mean=jnp.zeros((in_c,), jnp.float32),
                  var=jnp.ones((in_c,), jnp.float32)),
    )


def init_model(key, layers=(1, 1, 1, 1), non_layers=(0, 1, 1, 1),
               stripes=(2, 2, 2, 2), last_stride=1):
    ks = KeyGen(key)
    params = {"layers": [], "nl": [], "nl_idx": [], "stripes": list(stripes)}
    params["conv1_w"] = conv_init(ks(), (64, 3, 7, 7))
    params["bn1"] = bn_init(ks(), 64)
    inplanes = 64
    plane_list = (64, 128, 256, 512)
    stride_list = (1, 2, 2, last_stride)
    for li in range(4):
        planes, stride = plane_list[li], stride_list[li]
        blocks = []
        for bi in range(layers[li]):
            s = stride if bi == 0 else 1
            bp = {"stride": s}
            bp["conv1_w"] = conv_init(ks(), (planes, inplanes, 1, 1))
            bp["bn1"] = bn_init(ks(), planes)
            bp["conv2_w"] = conv_init(ks(), (planes, planes, 3, 3))
            bp["bn2"] = bn_init(ks(), planes)
            bp["conv3_w"] = conv_init(ks(), (planes * 4, planes, 1, 1))
            bp["bn3"] = bn_init(ks(), planes * 4)
            if bi == 0 and (s != 1 or inplanes != planes * 4):
                bp["down_w"] = conv_init(ks(), (planes * 4, inplanes, 1, 1))
                bp["down_bn"] = bn_init(ks(), planes * 4)
            blocks.append(bp)
            inplanes = planes * 4
        params["layers"].append(blocks)
        params["nl"].append(
            [nl_init(ks(), stripes[li], inplanes) for _ in range(non_layers[li])])
        params["nl_idx"].append(
            sorted([layers[li] - (i + 1) for i in range(non_layers[li])]))
    return params


# ----------------------------------------------------------------------------
if __name__ == "__main__":
    key = jax.random.PRNGKey(0)
    kparam, kx = jax.random.split(key)

    # Small config consistent with the module: stripe=2 divides the feature
    # heights at every non-local site (H=32 -> layer2 h=4, layer3/4 h=2), and
    # T=8 survives the two temporal pair-max pools plus the pairwise NL blocks.
    params = init_model(kparam, layers=(1, 1, 1, 1), non_layers=(0, 1, 1, 1),
                        stripes=(2, 2, 2, 2), last_stride=1)
    packed = prepare_params(params)

    B, T, C, H, W = 1, 8, 3, 32, 32
    x = jax.random.normal(kx, (B, T, C, H, W), jnp.float32)

    out = resnet_video_nonlocal_stripe_hr_fwd(packed, x)
    out = jax.block_until_ready(out)

    assert out.shape == (B, 2048, T // 4, 2, 2), out.shape
    assert bool(jnp.all(jnp.isfinite(out)))
    print("KERNEL_OK")
</pallas_src>

<mosaic_0001>
module attributes {stable_mosaic.version = 11 : i64} {
  func.func @_mm_kernel(%arg0: i32, %arg1: i32, %arg2: i32, %arg3: memref<256x256xbf16, #tpu.memory_space<vmem>>, %arg4: memref<256x128xbf16, #tpu.memory_space<vmem>>, %arg5: memref<1x128xf32, #tpu.memory_space<vmem>>, %arg6: memref<1x128xf32, #tpu.memory_space<vmem>>, %arg7: memref<256x128xbf16, #tpu.memory_space<vmem>>, %arg8: memref<256x128xf32, #tpu.memory_space<vmem>>) attributes {dimension_semantics = [#tpu.dimension_semantics<parallel>, #tpu.dimension_semantics<parallel>, #tpu.dimension_semantics<arbitrary>], iteration_bounds = array<i64: 8, 1, 1>, scalar_prefetch = 0 : i64, scratch_operands = 1 : i64, tpu.core_type = #tpu.core_type<tc>, window_params = [{transform_indices = @transform_0, window_bounds = array<i64: 256, 256>}, {transform_indices = @transform_1, window_bounds = array<i64: 256, 128>}, {transform_indices = @transform_2, window_bounds = array<i64: 1, 128>}, {transform_indices = @transform_3, window_bounds = array<i64: 1, 128>}, {transform_indices = @transform_4, window_bounds = array<i64: 256, 128>}]} {
    %c0_i32 = arith.constant 0 : i32
    %0 = arith.cmpi eq, %arg2, %c0_i32 : i32
    %1 = arith.extui %0 : i1 to i32
    %c0_i32_0 = arith.constant 0 : i32
    %2 = arith.cmpi ne, %1, %c0_i32_0 : i32
    scf.if %2 {
      %cst_10 = arith.constant 0.000000e+00 : f32
      %12 = vector.broadcast %cst_10 : f32 to vector<256x128xf32>
      %c0_11 = arith.constant 0 : index
      %c0_12 = arith.constant 0 : index
      %13 = vector.load %arg8[%c0_11, %c0_12] : memref<256x128xf32, #tpu.memory_space<vmem>>, vector<256x128xf32>
      tpu.vector_store %arg8[%c0_11, %c0_12], %12 {strides = array<i32>} : memref<256x128xf32, #tpu.memory_space<vmem>>, vector<256x128xf32>,
    } else {
    }
    %c0 = arith.constant 0 : index
    %c0_1 = arith.constant 0 : index
    %3 = vector.load %arg8[%c0, %c0_1] : memref<256x128xf32, #tpu.memory_space<vmem>>, vector<256x128xf32>
    %c0_2 = arith.constant 0 : index
    %c0_3 = arith.constant 0 : index
    %4 = vector.load %arg3[%c0_2, %c0_3] : memref<256x256xbf16, #tpu.memory_space<vmem>>, vector<256x256xbf16>
    %c0_4 = arith.constant 0 : index
    %c0_5 = arith.constant 0 : index
    %5 = vector.load %arg4[%c0_4, %c0_5] : memref<256x128xbf16, #tpu.memory_space<vmem>>, vector<256x128xbf16>
    %cst = arith.constant dense<0.000000e+00> : vector<256x128xf32>
    %6 = tpu.matmul %4, %5, %cst {dimension_numbers = #tpu.dot_dimension_numbers<[1], [0], [0], [1], [0, 0, 1, 1], [], []>} : vector<256x256xbf16>, vector<256x128xbf16>, vector<256x128xf32> -> vector<256x128xf32>
    %7 = arith.addf %3, %6 : vector<256x128xf32>
    %c0_6 = arith.constant 0 : index
    %c0_7 = arith.constant 0 : index
    %8 = vector.load %arg8[%c0_6, %c0_7] : memref<256x128xf32, #tpu.memory_space<vmem>>, vector<256x128xf32>
    tpu.vector_store %arg8[%c0_6, %c0_7], %7 {strides = array<i32>} : memref<256x128xf32, #tpu.memory_space<vmem>>, vector<256x128xf32>,
    %c0_i32_8 = arith.constant 0 : i32
    %9 = arith.cmpi eq, %arg2, %c0_i32_8 : i32
    %10 = arith.extui %9 : i1 to i32
    %c0_i32_9 = arith.constant 0 : i32
    %11 = arith.cmpi ne, %10, %c0_i32_9 : i32
    scf.if %11 {
      %c0_10 = arith.constant 0 : index
      %c0_11 = arith.constant 0 : index
      %12 = vector.load %arg8[%c0_10, %c0_11] : memref<256x128xf32, #tpu.memory_space<vmem>>, vector<256x128xf32>
      %c0_12 = arith.constant 0 : index
      %c0_13 = arith.constant 0 : index
      %13 = vector.load %arg5[%c0_12, %c0_13] : memref<1x128xf32, #tpu.memory_space<vmem>>, vector<1x128xf32>
      %14 = vector.broadcast %13 : vector<1x128xf32> to vector<256x128xf32>
      %15 = arith.mulf %12, %14 : vector<256x128xf32>
      %c0_14 = arith.constant 0 : index
      %c0_15 = arith.constant 0 : index
      %16 = vector.load %arg6[%c0_14, %c0_15] : memref<1x128xf32, #tpu.memory_space<vmem>>, vector<1x128xf32>
      %17 = vector.broadcast %16 : vector<1x128xf32> to vector<256x128xf32>
      %18 = arith.addf %15, %17 : vector<256x128xf32>
      %19 = arith.truncf %18 : vector<256x128xf32> to vector<256x128xbf16>
      %c0_16 = arith.constant 0 : index
      %c0_17 = arith.constant 0 : index
      %20 = vector.load %arg7[%c0_16, %c0_17] : memref<256x128xbf16, #tpu.memory_space<vmem>>, vector<256x128xbf16>
      tpu.vector_store %arg7[%c0_16, %c0_17], %19 {strides = array<i32>} : memref<256x128xbf16, #tpu.memory_space<vmem>>, vector<256x128xbf16>,
    } else {
    }
    return
  }
  func.func @transform_0(%arg0: i32, %arg1: i32, %arg2: i32) -> (i32, i32) {
    %c0_i32 = arith.constant 0 : i32
    return %arg0, %arg2 : i32, i32
  }
  func.func @transform_1(%arg0: i32, %arg1: i32, %arg2: i32) -> (i32, i32) {
    %c0_i32 = arith.constant 0 : i32
    return %arg2, %arg1 : i32, i32
  }
  func.func @transform_2(%arg0: i32, %arg1: i32, %arg2: i32) -> (i32, i32) {
    %c0_i32 = arith.constant 0 : i32
    %c0_i32_0 = arith.constant 0 : i32
    return %c0_i32, %arg1 : i32, i32
  }
  func.func @transform_3(%arg0: i32, %arg1: i32, %arg2: i32) -> (i32, i32) {
    %c0_i32 = arith.constant 0 : i32
    %c0_i32_0 = arith.constant 0 : i32
    return %c0_i32, %arg1 : i32, i32
  }
  func.func @transform_4(%arg0: i32, %arg1: i32, %arg2: i32) -> (i32, i32) {
    %c0_i32 = arith.constant 0 : i32
    return %arg0, %arg1 : i32, i32
  }
}

</mosaic_0001>

<bundles_post_ra>
// kernel: tpu_custom_call.1
= control target key start
LH: loop header
LB: loop body
LE: loop exit
PB: predicated region body
PF: predicated region fallthrough
CT: control target
= control target key end

     0   :  { %9 = vsyncpa [#allocation4], 0  ;;  %s2357_s0 = inlined_call_operand.hbm [shape: bf16[2048,256], index: 0, kind: input, shape index: {}]   ;;  %s2358_s1 = inlined_call_operand.hbm [shape: bf16[256,128], index: 1, kind: input, shape index: {}]   ;;  %s2359_s2 = inlined_call_operand.vmem [shape: f32[1,128], index: 2, kind: input, shape index: {}]   ;;  %s2360_s3 = inlined_call_operand.vmem [shape: f32[1,128], index: 3, kind: input, shape index: {}]   ;;  %s2361_s4 = inlined_call_operand.hbm [shape: bf16[2048,128], index: 4, kind: output, shape index: {}]  }
   0x1   :  { %11 = vsyncpa [#allocation4 + $0x1], 0 }
   0x2   :  { %12 = vsyncpa [#allocation7], 0 }
   0x3   :  { %13 = vsyncpa [#allocation5], 0 }
   0x4   :  { %15 = vsyncpa [#allocation5 + $0x1], 0  ;;  %s2012_s15 = smov 0   ;;  %s2014_s16 = smov 0  }
   0x5   :  { %s2016_s17 = smov 0   ;;  %s2018_s18 = smov 0  }
   0x6   :  { %s2020_s19 = smov 0   ;;  %s2022_s20 = smov 0  }
   0x7 LB: > { %s1329_s21 = sadd.s32 4294967295, %s1976_s20   ;;  %s1330_s22 = sadd.s32 4294967294, %s1976_s20   ;;  %s1976_s20 = sphi %s2022_s20, %s21_s20   ;;  %s1972_s19 = sphi %s2020_s19, %s2384_s19   ;;  %s1968_s18 = sphi %s2018_s18, %s2383_s18   ;;  %s1964_s17 = sphi %s2016_s17, %s2382_s17   ;;  %s1960_s16 = sphi %s2014_s16, %s2381_s16   ;;  %s1956_s15 = sphi %s2012_s15, %s2380_s15  }
   0x8   : > { %p62_p0 = scmp.ne.s32.totalorder %s1960_s16, %s1956_s15  ;;  %p2046_p1 = scmp.eq.s32.totalorder %s1329_s21, 0 }
   0x9   : > { %p2050_p2 = scmp.eq.s32.totalorder %s1329_s21, 7  ;;  %p174_p3 = scmp.eq.s32.totalorder %s1330_s22, 7 }
   0xa   : > { %s2366_s23 = scalar_select %p2046_p1, 1, 0 }
   0xb   : > { %s2367_s24 = scalar_select %p2050_p2, 1, 0 }
   0xc   : > { %p2056_p4 = por %p2046_p1, %p62_p0  ;;  %p1331_p5 = scmp.ge.s32.totalorder %s1976_s20, 1 }
   0xd   : > { %p2061_p6 = por %p174_p3, %p62_p0  ;;  %p181_p7 = scmp.lt.s32.totalorder %s1976_s20, 9 }
   0xe   : > { %s2368_s25 = scalar_select %p2056_p4, 1, 0 }
   0xf   : > { %s2369_s26 = scalar_select %p2061_p6, 1, 0 }
  0x10   : > { %p2066_p8 = pnand %p1331_p5, %p181_p7  ;;  %s1978_s28 = smov [#allocation6]  }
  0x11   : > { %s197_s29 = sshll.u32 %s1978_s28, 4  ;;  %s40_s5 = sadd.s32 1, %s1972_s19  ;;  %s198_s29 = int_to_ptr.vmem [resolvable:$true] %s197_s29 }
  0x12   : > { %s2370_s27 = scalar_select %p2066_p8, 1, 0 }
  0x13   : > { %p1697_p9 = pneg %p2066_p8  ;;  %s1832_s8 = scalar_lea.hbm %s2358_s1, 2048 }
  0x14   : > { %p1833_p11 = scmp.ne.s32.totalorder %s2358_s1, %s1832_s8  ;;  %p1839_p3 = scmp.lt.u32.totalorder %s1832_s8, %s2358_s1 }
  0x15   : > { %p2074_p10 = pnand %p1697_p9, %p2046_p1 }
  0x17   : > { %p1834_p12 = pneg %p2074_p10 }
  0x19   : > { %p1835_p13 = pnand %p1834_p12, %p1833_p11 }
  0x1b   : > { %p1836_p0 = pneg %p1835_p13 }
  0x1d   : > { %p1841_p5 = pnand %p1839_p3, %p1836_p0 }
  0x1f   : > { %1844 = shalt.err (!%p1841_p5)
}
  0x20   : > { %s1845_s13 = scalar_lea.vmem %s198_s29, 2048  ;;  %p1853_p1 = scmp.lt.s32.totalorder %s198_s29, %s198_s29 }
  0x21   : > { %p1846_p7 = scmp.ne.s32.totalorder %s198_s29, %s1845_s13  ;;  %p1854_p4 = scmp.lt.s32.totalorder %s1845_s13, %s1845_s13 }
  0x23   : > { %p1848_p9 = pnand %p1846_p7, %p1834_p12  ;;  %p1855_p8 = por %p1854_p4, %p1853_p1 }
  0x25   : > { %p1849_p6 = pneg %p1848_p9 }
  0x27   : > { %p1856_p2 = pnand %p1855_p8, %p1849_p6 }
  0x29   : > { %1859 = shalt.err (!%p1856_p2)
}
  0x2a   : > { %s1979_s14 = smov 64   ;;  %s1980_s21 = smov 4  }
  0x2b   : > { %1700 = dma.hbm_to_vmem [thread:$0]  (!%p2074_p10), %s2358_s1, 2048, %s198_s29, [#allocation7], %s1979_s14, %s1979_s14, %s1980_s21  }
  0x2c   : > { %p42_p1 = scmp.ge.s32.totalorder %s40_s5, 8  ;;  %s49_s6 = sadd.s32 1, %s1964_s17 }
  0x2d   : > { %p56_p2 = scmp.ne.s32.totalorder %s1964_s17, %s1960_s16  ;;  %p57_p4 = scmp.eq.s32.totalorder %s1976_s20, 0 }
  0x2e   : > { %s2386_s5 = smov (%p42_p1, %s40_s5), 0  ;;  %p2373_p8 = scmp.ne.s32.totalorder %s2367_s24, 0 }
  0x2f   : > { %p2101_p6 = por %p57_p4, %p56_p2  ;;  %s44_s30 = ssub.s32 %s1972_s19, %s2386_s5 }
  0x30   : > { %p2107_p11 = por %p2373_p8, %p56_p2  ;;  %p1710_p12 = scmp.lt.s32.totalorder %s1976_s20, 8 }
  0x31   : > { %p47_p10 = scmp.eq.s32.totalorder %s44_s30, 0  ;;  %s223_s29 = sand.u32 1, %s1964_s17  }
  0x32   : > { %s1336_s9 = sshll.u32 %s223_s29, 8  ;;  %s1432_s11 = sshll.u32 %s1972_s19, 12 }
  0x33   : > { %s2116_s10 = scalar_select %p47_p10, %s1964_s17, %s49_s6  }
  0x34   : > { %s2122_s14 = scalar_lea.hbm %s2357_s0, %s1432_s11  ;;  %s227_s24 = scalar_lea.vmem [#allocation3], %s1336_s9 }
  0x35   : > { %s237_s21 = sshll.u32 %s227_s24, 4  ;;  %p2128_p13 = pnand %p1710_p12, %p2101_p6  ;;  %s2124_s21 = int_to_ptr.vmem [resolvable:$true] %s237_s21 }
  0x36   : > { %s2132_s28 = scalar_lea.sflag [#allocation4], %s223_s29  ;;  %s1860_s6 = scalar_lea.hbm %s2122_s14, 4096 }
  0x37   : > { %p1861_p0 = scmp.ne.s32.totalorder %s2122_s14, %s1860_s6  ;;  %p1862_p3 = pneg %p2128_p13 }
  0x38   : > { %s1865_s7 = scalar_lea.hbm %s2357_s0, 32768  ;;  %p1866_p9 = scmp.lt.u32.totalorder %s2122_s14, %s2357_s0 }
  0x39   : > { %p1863_p5 = pnand %p1862_p3, %p1861_p0  ;;  %p1867_p1 = scmp.lt.u32.totalorder %s1865_s7, %s1860_s6 }
  0x3a   : > { %p1869_p4 = scmp.lt.u32.totalorder %s1860_s6, %s2122_s14 }
  0x3b   : > { %p1864_p7 = pneg %p1863_p5  ;;  %p1868_p2 = por %p1867_p1, %p1866_p9 }
  0x3d   : > { %p1870_p6 = por %p1869_p4, %p1868_p2 }
  0x3f   : > { %p1871_p8 = pnand %p1870_p6, %p1864_p7 }
  0x41   : > { %1874 = shalt.err (!%p1871_p8)
}
  0x42   : > { %s1875_s29 = scalar_lea.vmem %s2124_s21, 4096  ;;  %s1981_s13 = smov [#allocation3]  }
  0x43   : > { %p1876_p12 = scmp.ne.s32.totalorder %s2124_s21, %s1875_s29  ;;  %s1880_s24 = sshll.u32 %s1981_s13, 4  ;;  %s1881_s24 = int_to_ptr.vmem [resolvable:$false] %s1880_s24 }
  0x44   : > { %s1882_s30 = scalar_lea.vmem %s1881_s24, 8192  ;;  %p1883_p5 = scmp.lt.s32.totalorder %s2124_s21, %s1881_s24 }
  0x45   : > { %p1878_p10 = pnand %p1876_p12, %p1862_p3  ;;  %p1884_p9 = scmp.lt.s32.totalorder %s1882_s30, %s1875_s29 }
  0x47   : > { %p1879_p0 = pneg %p1878_p10  ;;  %p1885_p1 = por %p1884_p9, %p1883_p5 }
  0x49   : > { %p1886_p2 = pnand %p1885_p1, %p1879_p0 }
  0x4b   : > { %1889 = shalt.err (!%p1886_p2)
}
  0x4c   : > { %s1982_s6 = smov 128   ;;  %s1983_s9 = smov 8  }
  0x4d   : > { %1704 = dma.hbm_to_vmem [thread:$0]  (!%p2128_p13), %s2122_s14, 4096, %s2124_s21, %s2132_s28, %s1982_s6, %s1982_s6, %s1983_s9  }
  0x4e   : > { %p2376_p3 = scmp.ne.s32.totalorder %s2370_s27, 0 }
  0x4f   : > { %s2163_s7 = sand.u32 (!%p2376_p3), 1, %s1960_s16   ;;  %p2377_p7 = scmp.ne.s32.totalorder (!%p2376_p3), %s2368_s25, 0 }
  0x50   : > { %249 = sbr.rel (%p2376_p3) target bundleno = 419 (0x1a3), region = 36  ;;  %s1341_s11 = sshll.u32 (!%p2376_p3), %s2163_s7, 8 }
  0x51   : > { %s252_s12 = scalar_lea.sflag (!%p2376_p3), [#allocation4], %s2163_s7  ;;  %s2167_s29 = scalar_lea.vmem (!%p2376_p3), [#allocation3], %s1341_s11 }
  0x57   : > { %1943 = dma.done.wait (%p2377_p7), %s252_s12, 4096  }
  0x58   : > { %1945 = vsyncadd (%p2377_p7), %s252_s12, 4294963200  ;;  %p2378_p13 = scmp.ne.s32.totalorder %s2366_s23, 0 }
  0x5a   : > { %1947 = dma.done.wait (%p2378_p13), [#allocation7], 2048  }
  0x5b   : > { %1949 = vsyncadd (%p2378_p13), [#allocation7], 4294965248  ;;  %v1768_v0 = vld [vmem:[#allocation6 + $0x40] sm:$0xff]   ;;  %v1770_v2 = vld [vmem:[#allocation6 + $0x48] sm:$0xff]   ;;  %s1343_s21 = sshll.u32 %s2163_s7, 7  ;;  %s1465_s28 = sshll.u32 %s1968_s18, 11 }
  0x5c   : > { %v1769_v1 = vld [vmem:[#allocation6] sm:$0xff]   ;;  %1561 = vmatprep.subr.bf16.mxu0 %v1768_v0  ;;  %1673 = vmatprep.subr.bf16.mxu1 %v1768_v0  ;;  %v1771_v3 = vld [vmem:[#allocation6 + $0x8] sm:$0xff]   ;;  %v1772_v4 = vld [vmem:[#allocation6 + $0x50] sm:$0xff]   ;;  %s2228_s22 = scalar_lea.vmem [#allocation8], %s1343_s21  ;;  %s2305_s6 = scalar_lea.hbm %s2361_s4, %s1465_s28 }
  0x5d   : > { %1562 = vmatpush3.bf16.msra.mxu0 %v1769_v1  ;;  %1681 = vmatpush3.bf16.msra.mxu1 %v1769_v1  ;;  %v1773_v5 = vld [vmem:[#allocation6 + $0x10] sm:$0xff]   ;;  %v1774_v6 = vld [vmem:[#allocation6 + $0x58] sm:$0xff]   ;;  %v1776_v8 = vld [vmem:[#allocation6 + $0x60] sm:$0xff]   ;;  %s1202_s13 = sshll.u32 %s2228_s22, 4  ;;  %s1188_s18 = scalar_lea.sflag [#allocation5], %s2163_s7  ;;  %s2307_s13 = int_to_ptr.vmem [resolvable:$true] %s1202_s13 }
  0x5e   : > { %1563 = vmatprep.subr.bf16.mxu0 %v1770_v2  ;;  %1674 = vmatprep.subr.bf16.mxu1 %v1770_v2  ;;  %v1775_v7 = vld [vmem:[#allocation6 + $0x18] sm:$0xff]   ;;  %v1777_v9 = vld [vmem:[#allocation6 + $0x20] sm:$0xff]   ;;  %v1778_v10 = vld [vmem:[#allocation6 + $0x68] sm:$0xff]   ;;  %s1890_s9 = scalar_lea.vmem %s2307_s13, 2048  ;;  %s1984_s11 = smov [#allocation8]  }
  0x5f   : > { %v1786_v11 = vld [vmem:[%s2167_s29 + $0x4] ss:$8 sps:$4 sm:$0xff]   ;;  %v1780_v14 = vld [vmem:[#allocation6 + $0x70] sm:$0xff]   ;;  %v1782_v16 = vld [vmem:[#allocation6 + $0x78] sm:$0xff]   ;;  %p1891_p4 = scmp.ne.s32.totalorder %s2307_s13, %s1890_s9  ;;  %s1894_s12 = sshll.u32 %s1984_s11, 4  ;;  %s1895_s12 = int_to_ptr.vmem [resolvable:$false] %s1894_s12 }
  0x60   : > { %v1789_v12 = vld [vmem:[%s2167_s29 + $0x84] ss:$8 sps:$4 sm:$0xff]   ;;  %721 = vmatprep.mubr.bf16.mxu0 %v1786_v11  ;;  %v1781_v15 = vld [vmem:[#allocation6 + $0x30] sm:$0xff]   ;;  %v1783_v17 = vld [vmem:[#allocation6 + $0x38] sm:$0xff]   ;;  %p1897_p12 = scmp.lt.s32.totalorder %s2307_s13, %s1895_s12 }
  0x61   : > { %1564 = vmatpush3.bf16.msra.mxu0 %v1771_v3  ;;  %1682 = vmatpush3.bf16.msra.mxu1 %v1771_v3  ;;  %v1779_v13 = vld [vmem:[#allocation6 + $0x28] sm:$0xff]   ;;  %v1790_v20 = vld [vmem:[%s2167_s29 + $0x14] ss:$8 sps:$4 sm:$0xff]   ;;  %v1794_v22 = vld [vmem:[%s2167_s29 + $0x10] ss:$8 sps:$4 sm:$0xff]   ;;  %p1892_p6 = pnand %p1891_p4, %p2107_p11 }
  0x62   : > { %1565 = vmatprep.subr.bf16.mxu0 %v1772_v4  ;;  %1675 = vmatprep.subr.bf16.mxu1 %v1772_v4  ;;  %v1784_v18 = vld [vmem:[%s2167_s29] ss:$8 sps:$4 sm:$0xff]   ;;  %v1792_v21 = vld [vmem:[%s2167_s29 + $0x94] ss:$8 sps:$4 sm:$0xff]   ;;  %v1795_v23 = vld [vmem:[%s2167_s29 + $0x90] ss:$8 sps:$4 sm:$0xff]  }
  0x63   : > { %785 = vmatprep.mubr.bf16.mxu1 %v1789_v12  ;;  %v1787_v19 = vld [vmem:[%s2167_s29 + $0x80] ss:$8 sps:$4 sm:$0xff]   ;;  %v1796_v24 = vld [vmem:[%s2167_s29 + $0x24] ss:$8 sps:$4 sm:$0xff]   ;;  %v1802_v28 = vld [vmem:[%s2167_s29 + $0x34] ss:$8 sps:$4 sm:$0xff]   ;;  %p1893_p8 = pneg %p1892_p6 }
  0x64   : > { %v1798_v25 = vld [vmem:[%s2167_s29 + $0xa4] ss:$8 sps:$4 sm:$0xff]   ;;  %v1800_v26 = vld [vmem:[%s2167_s29 + $0x20] ss:$8 sps:$4 sm:$0xff]   ;;  %v1804_v29 = vld [vmem:[%s2167_s29 + $0xb4] ss:$8 sps:$4 sm:$0xff]  }
  0x65   : > { %1566 = vmatpush3.bf16.msra.mxu0 %v1773_v5  ;;  %1683 = vmatpush3.bf16.msra.mxu1 %v1773_v5  ;;  %v1801_v27 = vld [vmem:[%s2167_s29 + $0xa0] ss:$8 sps:$4 sm:$0xff]   ;;  %v1806_v30 = vld [vmem:[%s2167_s29 + $0x30] ss:$8 sps:$4 sm:$0xff]   ;;  %v1808_v32 = vld [vmem:[%s2167_s29 + $0x44] ss:$8 sps:$4 sm:$0xff]  }
  0x66   : > { %1567 = vmatprep.subr.bf16.mxu0 %v1774_v6  ;;  %1676 = vmatprep.subr.bf16.mxu1 %v1774_v6  ;;  %v1807_v31 = vld [vmem:[%s2167_s29 + $0xb0] ss:$8 sps:$4 sm:$0xff]   ;;  %v1810_v33 = vld [vmem:[%s2167_s29 + $0xc4] ss:$8 sps:$4 sm:$0xff]   ;;  %v1812_v34 = vld [vmem:[%s2167_s29 + $0x40] ss:$8 sps:$4 sm:$0xff]  }
  0x67   : > { %v1813_v35 = vld [vmem:[%s2167_s29 + $0xc0] ss:$8 sps:$4 sm:$0xff]   ;;  %v1814_v36 = vld [vmem:[%s2167_s29 + $0x54] ss:$8 sps:$4 sm:$0xff]   ;;  %v1818_v38 = vld [vmem:[%s2167_s29 + $0x50] ss:$8 sps:$4 sm:$0xff]  }
  0x68   : > { %v1816_v37 = vld [vmem:[%s2167_s29 + $0xd4] ss:$8 sps:$4 sm:$0xff]   ;;  %v1819_v39 = vld [vmem:[%s2167_s29 + $0xd0] ss:$8 sps:$4 sm:$0xff]   ;;  %v1820_v40 = vld [vmem:[%s2167_s29 + $0x64] ss:$8 sps:$4 sm:$0xff]  }
  0x69   : > { %1568 = vmatpush3.bf16.msra.mxu0 %v1775_v7  ;;  %1684 = vmatpush3.bf16.msra.mxu1 %v1775_v7  ;;  %v1822_v41 = vld [vmem:[%s2167_s29 + $0xe4] ss:$8 sps:$4 sm:$0xff]   ;;  %v1824_v42 = vld [vmem:[%s2167_s29 + $0x60] ss:$8 sps:$4 sm:$0xff]   ;;  %v1826_v44 = vld [vmem:[%s2167_s29 + $0x74] ss:$8 sps:$4 sm:$0xff]  }
  0x6a   : > { %1569 = vmatprep.subr.bf16.mxu0 %v1776_v8  ;;  %1677 = vmatprep.subr.bf16.mxu1 %v1776_v8  ;;  %v1825_v43 = vld [vmem:[%s2167_s29 + $0xe0] ss:$8 sps:$4 sm:$0xff]   ;;  %v1828_v45 = vld [vmem:[%s2167_s29 + $0xf4] ss:$8 sps:$4 sm:$0xff]   ;;  %v1830_v46 = vld [vmem:[%s2167_s29 + $0x70] ss:$8 sps:$4 sm:$0xff]  }
  0x6b   : > { %v1831_v47 = vld [vmem:[%s2167_s29 + $0xf0] ss:$8 sps:$4 sm:$0xff]   ;;  %v2212_v51 = vld [vmem:[%s2359_s2] ss:$0 sm:$0xff]  ;;  %s1896_s29 = scalar_lea.vmem %s1895_s12, 4096 }
  0x6c   : > { %v2219_v63 = vld [vmem:[%s2360_s3] ss:$0 sm:$0xff]  ;;  %p1898_p10 = scmp.lt.s32.totalorder %s1896_s29, %s1890_s9 }
  0x6d   : > { %1570 = vmatpush3.bf16.msra.mxu0 %v1777_v9  ;;  %1685 = vmatpush3.bf16.msra.mxu1 %v1777_v9 }
  0x6e   : > { %1571 = vmatprep.subr.bf16.mxu0 %v1778_v10  ;;  %1678 = vmatprep.subr.bf16.mxu1 %v1778_v10  ;;  %p1899_p0 = por %p1898_p10, %p1897_p12 }
  0x70   : > { %p1900_p5 = pnand %p1899_p0, %p1893_p8 }
  0x71   : > { %1572 = vmatpush3.bf16.msra.mxu0 %v1779_v13  ;;  %1686 = vmatpush3.bf16.msra.mxu1 %v1779_v13 }
  0x72   : > { %1573 = vmatprep.subr.bf16.mxu0 %v1780_v14  ;;  %1679 = vmatprep.subr.bf16.mxu1 %v1780_v14 }
  0x75   : > { %1574 = vmatpush3.bf16.msra.mxu0 %v1781_v15  ;;  %1687 = vmatpush3.bf16.msra.mxu1 %v1781_v15 }
  0x76   : > { %1575 = vmatprep.subr.bf16.mxu0 %v1782_v16  ;;  %1680 = vmatprep.subr.bf16.mxu1 %v1782_v16 }
  0x79   : > { %1576 = vmatpush3.bf16.msra.mxu0 %v1783_v17  ;;  %1688 = vmatpush3.bf16.msra.mxu1 %v1783_v17 }
  0x7c   : > { %722 = vmatmul.mubr.bf16.vlgmr.msra.gmra.mrb[0].mxu0 %v1784_v18  ;;  %786 = vmatmul.mubr.bf16.vlgmr.msra.gmra.mrb[0].mxu1 %v1787_v19 }
  0x7d   : > { %729 = vmatprep.mubr.bf16.mxu0 %v1790_v20  ;;  %793 = vmatprep.mubr.bf16.mxu1 %v1792_v21 }
  0x84   : > { %730 = vmatmul.mubr.bf16.gmra.mrb[4].mxu0 %v1794_v22  ;;  %794 = vmatmul.mubr.bf16.gmra.mrb[4].mxu1 %v1795_v23 }
  0x85   : > { %737 = vmatprep.mubr.bf16.mxu0 %v1796_v24  ;;  %801 = vmatprep.mubr.bf16.mxu1 %v1798_v25 }
  0x8c   : > { %738 = vmatmul.mubr.bf16.gmra.mrb[8].mxu0 %v1800_v26  ;;  %802 = vmatmul.mubr.bf16.gmra.mrb[8].mxu1 %v1801_v27 }
  0x8d   : > { %745 = vmatprep.mubr.bf16.mxu0 %v1802_v28  ;;  %809 = vmatprep.mubr.bf16.mxu1 %v1804_v29 }
  0x94   : > { %746 = vmatmul.mubr.bf16.gmra.mrb[12].mxu0 %v1806_v30  ;;  %810 = vmatmul.mubr.bf16.gmra.mrb[12].mxu1 %v1807_v31 }
  0x95   : > { %753 = vmatprep.mubr.bf16.mxu0 %v1808_v32  ;;  %817 = vmatprep.mubr.bf16.mxu1 %v1810_v33 }
  0x9c   : > { %754 = vmatmul.mubr.bf16.gmra.mrb[16].mxu0 %v1812_v34  ;;  %818 = vmatmul.mubr.bf16.gmra.mrb[16].mxu1 %v1813_v35 }
  0x9d   : > { %761 = vmatprep.mubr.bf16.mxu0 %v1814_v36  ;;  %825 = vmatprep.mubr.bf16.mxu1 %v1816_v37 }
  0xa4   : > { %762 = vmatmul.mubr.bf16.gmra.mrb[20].mxu0 %v1818_v38  ;;  %826 = vmatmul.mubr.bf16.gmra.mrb[20].mxu1 %v1819_v39 }
  0xa5   : > { %769 = vmatprep.mubr.bf16.mxu0 %v1820_v40  ;;  %833 = vmatprep.mubr.bf16.mxu1 %v1822_v41 }
  0xac   : > { %770 = vmatmul.mubr.bf16.gmra.mrb[24].mxu0 %v1824_v42  ;;  %834 = vmatmul.mubr.bf16.gmra.mrb[24].mxu1 %v1825_v43 }
  0xad   : > { %777 = vmatprep.mubr.bf16.mxu0 %v1826_v44  ;;  %841 = vmatprep.mubr.bf16.mxu1 %v1828_v45 }
  0xb4   : > { %778 = vmatmul.mubr.bf16.gmra.mrb[28].mxu0 %v1830_v46  ;;  %842 = vmatmul.mubr.bf16.gmra.mrb[28].mxu1 %v1831_v47 }
 0x14f   : > { %v1577_v48 = vpop.f32.mrb[0].mxu0  ;;  %v1625_v49 = vpop.f32.mrb[0].mxu1 }
 0x150   : > { %v1578_v50 = vpop.f32.mrb[1].mxu0  ;;  %v1626_v52 = vpop.f32.mrb[1].mxu1 }
 0x151   : > { %v1579_v53 = vadd.f32 %v1578_v50, %v1577_v48  ;;  %v1627_v54 = vadd.f32 %v1626_v52, %v1625_v49  ;;  %v1580_v55 = vpop.f32.mrb[2].mxu0  ;;  %v1628_v56 = vpop.f32.mrb[2].mxu1 }
 0x152   : > { %v1581_v57 = vpop.f32.mrb[3].mxu0  ;;  %v1629_v58 = vpop.f32.mrb[3].mxu1 }
 0x153   : > { %v956_v59 = vmul.f32 %v1579_v53, %v2212_v51  ;;  %v972_v60 = vmul.f32 %v1627_v54, %v2212_v51  ;;  %v1582_v61 = vadd.f32 %v1581_v57, %v1580_v55  ;;  %v1630_v62 = vadd.f32 %v1629_v58, %v1628_v56 }
 0x155   : > { %v957_v0 = vmul.f32 %v1582_v61, %v2212_v51  ;;  %v973_v1 = vmul.f32 %v1630_v62, %v2212_v51  ;;  %v995_v2 = vadd.f32 %v2219_v63, %v956_v59  ;;  %v1011_v3 = vadd.f32 %v2219_v63, %v972_v60 }
 0x157   : > { %v996_v4 = vadd.f32 %v2219_v63, %v957_v0  ;;  %v1012_v5 = vadd.f32 %v2219_v63, %v973_v1  ;;  %v1583_v6 = vpop.f32.mrb[4].mxu0  ;;  %v1631_v7 = vpop.f32.mrb[4].mxu1 }
 0x158   : > { %v1584_v8 = vpop.f32.mrb[5].mxu0  ;;  %v1632_v9 = vpop.f32.mrb[5].mxu1 }
 0x159   : > { %v1469_v10 = vpack.c.bf16 %v996_v4, %v995_v2  ;;  %v1509_v11 = vpack.c.bf16 %v1012_v5, %v1011_v3  ;;  %v1585_v12 = vadd.f32 %v1584_v8, %v1583_v6  ;;  %v1633_v13 = vadd.f32 %v1632_v9, %v1631_v7  ;;  %v1586_v14 = vpop.f32.mrb[6].mxu0  ;;  %v1634_v15 = vpop.f32.mrb[6].mxu1 }
 0x15a   : > { %v1587_v16 = vpop.f32.mrb[7].mxu0  ;;  %v1635_v17 = vpop.f32.mrb[7].mxu1 }
 0x15b   : > { %1470 = vst [vmem:[%s2228_s22] sm:$0xff] %v1469_v10   ;;  %1553 = vst [vmem:[%s2228_s22 + $0x40] sm:$0xff] %v1509_v11   ;;  %v958_v18 = vmul.f32 %v1585_v12, %v2212_v51  ;;  %v974_v19 = vmul.f32 %v1633_v13, %v2212_v51  ;;  %v1588_v20 = vadd.f32 %v1587_v16, %v1586_v14 }
 0x15c   : > { %v1636_v21 = vadd.f32 %v1635_v17, %v1634_v15 }
 0x15d   : > { %v959_v22 = vmul.f32 %v1588_v20, %v2212_v51  ;;  %v997_v24 = vadd.f32 %v2219_v63, %v958_v18  ;;  %v1013_v25 = vadd.f32 %v2219_v63, %v974_v19 }
 0x15e   : > { %v975_v23 = vmul.f32 %v1636_v21, %v2212_v51 }
 0x15f   : > { %v998_v26 = vadd.f32 %v2219_v63, %v959_v22  ;;  %v1589_v28 = vpop.f32.mrb[8].mxu0  ;;  %v1637_v29 = vpop.f32.mrb[8].mxu1 }
 0x160   : > { %v1014_v27 = vadd.f32 %v2219_v63, %v975_v23  ;;  %v1590_v30 = vpop.f32.mrb[9].mxu0  ;;  %v1638_v31 = vpop.f32.mrb[9].mxu1 }
 0x161   : > { %v1474_v32 = vpack.c.bf16 %v998_v26, %v997_v24  ;;  %v1591_v34 = vadd.f32 %v1590_v30, %v1589_v28  ;;  %v1639_v35 = vadd.f32 %v1638_v31, %v1637_v29  ;;  %v1592_v36 = vpop.f32.mrb[10].mxu0  ;;  %v1640_v37 = vpop.f32.mrb[10].mxu1 }
 0x162   : > { %v1514_v33 = vpack.c.bf16 %v1014_v27, %v1013_v25  ;;  %v1593_v38 = vpop.f32.mrb[11].mxu0  ;;  %v1641_v39 = vpop.f32.mrb[11].mxu1 }
 0x163   : > { %1546 = vst [vmem:[%s2228_s22 + $0x8] sm:$0xff] %v1474_v32   ;;  %v960_v40 = vmul.f32 %v1591_v34, %v2212_v51  ;;  %v976_v41 = vmul.f32 %v1639_v35, %v2212_v51  ;;  %v1594_v42 = vadd.f32 %v1593_v38, %v1592_v36  ;;  %v1642_v43 = vadd.f32 %v1641_v39, %v1640_v37 }
 0x164   : > { %1554 = vst [vmem:[%s2228_s22 + $0x48] sm:$0xff] %v1514_v33  }
 0x165   : > { %v961_v44 = vmul.f32 %v1594_v42, %v2212_v51  ;;  %v977_v45 = vmul.f32 %v1642_v43, %v2212_v51  ;;  %v999_v46 = vadd.f32 %v2219_v63, %v960_v40  ;;  %v1015_v47 = vadd.f32 %v2219_v63, %v976_v41 }
 0x167   : > { %v1000_v48 = vadd.f32 %v2219_v63, %v961_v44  ;;  %v1016_v49 = vadd.f32 %v2219_v63, %v977_v45  ;;  %v1595_v50 = vpop.f32.mrb[12].mxu0  ;;  %v1643_v52 = vpop.f32.mrb[12].mxu1 }
 0x168   : > { %v1596_v53 = vpop.f32.mrb[13].mxu0  ;;  %v1644_v54 = vpop.f32.mrb[13].mxu1 }
 0x169   : > { %v1479_v55 = vpack.c.bf16 %v1000_v48, %v999_v46  ;;  %v1519_v56 = vpack.c.bf16 %v1016_v49, %v1015_v47  ;;  %v1597_v57 = vadd.f32 %v1596_v53, %v1595_v50  ;;  %v1645_v58 = vadd.f32 %v1644_v54, %v1643_v52  ;;  %v1598_v59 = vpop.f32.mrb[14].mxu0  ;;  %v1646_v60 = vpop.f32.mrb[14].mxu1 }
 0x16a   : > { %v1599_v61 = vpop.f32.mrb[15].mxu0  ;;  %v1647_v62 = vpop.f32.mrb[15].mxu1 }
 0x16b   : > { %1547 = vst [vmem:[%s2228_s22 + $0x10] sm:$0xff] %v1479_v55   ;;  %1555 = vst [vmem:[%s2228_s22 + $0x50] sm:$0xff] %v1519_v56   ;;  %v962_v0 = vmul.f32 %v1597_v57, %v2212_v51  ;;  %v978_v1 = vmul.f32 %v1645_v58, %v2212_v51  ;;  %v1600_v2 = vadd.f32 %v1599_v61, %v1598_v59 }
 0x16c   : > { %v1648_v3 = vadd.f32 %v1647_v62, %v1646_v60 }
 0x16d   : > { %v963_v4 = vmul.f32 %v1600_v2, %v2212_v51  ;;  %v1001_v6 = vadd.f32 %v2219_v63, %v962_v0  ;;  %v1017_v7 = vadd.f32 %v2219_v63, %v978_v1 }
 0x16e   : > { %v979_v5 = vmul.f32 %v1648_v3, %v2212_v51 }
 0x16f   : > { %v1002_v8 = vadd.f32 %v2219_v63, %v963_v4  ;;  %v1601_v10 = vpop.f32.mrb[16].mxu0  ;;  %v1649_v11 = vpop.f32.mrb[16].mxu1 }
 0x170   : > { %v1018_v9 = vadd.f32 %v2219_v63, %v979_v5  ;;  %v1602_v12 = vpop.f32.mrb[17].mxu0  ;;  %v1650_v13 = vpop.f32.mrb[17].mxu1 }
 0x171   : > { %v1484_v14 = vpack.c.bf16 %v1002_v8, %v1001_v6  ;;  %v1603_v16 = vadd.f32 %v1602_v12, %v1601_v10  ;;  %v1651_v17 = vadd.f32 %v1650_v13, %v1649_v11  ;;  %v1604_v18 = vpop.f32.mrb[18].mxu0  ;;  %v1652_v19 = vpop.f32.mrb[18].mxu1 }
 0x172   : > { %v1524_v15 = vpack.c.bf16 %v1018_v9, %v1017_v7  ;;  %v1605_v20 = vpop.f32.mrb[19].mxu0  ;;  %v1653_v21 = vpop.f32.mrb[19].mxu1 }
 0x173   : > { %1548 = vst [vmem:[%s2228_s22 + $0x18] sm:$0xff] %v1484_v14   ;;  %v964_v22 = vmul.f32 %v1603_v16, %v2212_v51  ;;  %v980_v23 = vmul.f32 %v1651_v17, %v2212_v51  ;;  %v1606_v24 = vadd.f32 %v1605_v20, %v1604_v18  ;;  %v1654_v25 = vadd.f32 %v1653_v21, %v1652_v19 }
 0x174   : > { %1556 = vst [vmem:[%s2228_s22 + $0x58] sm:$0xff] %v1524_v15  }
 0x175   : > { %v965_v26 = vmul.f32 %v1606_v24, %v2212_v51  ;;  %v981_v27 = vmul.f32 %v1654_v25, %v2212_v51  ;;  %v1003_v28 = vadd.f32 %v2219_v63, %v964_v22  ;;  %v1019_v29 = vadd.f32 %v2219_v63, %v980_v23 }
 0x177   : > { %v1004_v30 = vadd.f32 %v2219_v63, %v965_v26  ;;  %v1020_v31 = vadd.f32 %v2219_v63, %v981_v27  ;;  %v1607_v32 = vpop.f32.mrb[20].mxu0  ;;  %v1655_v33 = vpop.f32.mrb[20].mxu1 }
 0x178   : > { %v1608_v34 = vpop.f32.mrb[21].mxu0  ;;  %v1656_v35 = vpop.f32.mrb[21].mxu1 }
 0x179   : > { %v1489_v36 = vpack.c.bf16 %v1004_v30, %v1003_v28  ;;  %v1529_v37 = vpack.c.bf16 %v1020_v31, %v1019_v29  ;;  %v1609_v38 = vadd.f32 %v1608_v34, %v1607_v32  ;;  %v1657_v39 = vadd.f32 %v1656_v35, %v1655_v33  ;;  %v1610_v40 = vpop.f32.mrb[22].mxu0  ;;  %v1658_v41 = vpop.f32.mrb[22].mxu1 }
 0x17a   : > { %v1611_v42 = vpop.f32.mrb[23].mxu0  ;;  %v1659_v43 = vpop.f32.mrb[23].mxu1 }
 0x17b   : > { %1549 = vst [vmem:[%s2228_s22 + $0x20] sm:$0xff] %v1489_v36   ;;  %1557 = vst [vmem:[%s2228_s22 + $0x60] sm:$0xff] %v1529_v37   ;;  %v966_v44 = vmul.f32 %v1609_v38, %v2212_v51  ;;  %v982_v45 = vmul.f32 %v1657_v39, %v2212_v51  ;;  %v1612_v46 = vadd.f32 %v1611_v42, %v1610_v40 }
 0x17c   : > { %v1660_v47 = vadd.f32 %v1659_v43, %v1658_v41 }
 0x17d   : > { %v967_v48 = vmul.f32 %v1612_v46, %v2212_v51  ;;  %v1005_v50 = vadd.f32 %v2219_v63, %v966_v44  ;;  %v1021_v52 = vadd.f32 %v2219_v63, %v982_v45 }
 0x17e   : > { %v983_v49 = vmul.f32 %v1660_v47, %v2212_v51 }
 0x17f   : > { %v1006_v53 = vadd.f32 %v2219_v63, %v967_v48  ;;  %v1613_v55 = vpop.f32.mrb[24].mxu0  ;;  %v1661_v56 = vpop.f32.mrb[24].mxu1 }
 0x180   : > { %v1022_v54 = vadd.f32 %v2219_v63, %v983_v49  ;;  %v1614_v57 = vpop.f32.mrb[25].mxu0  ;;  %v1662_v58 = vpop.f32.mrb[25].mxu1 }
 0x181   : > { %v1494_v59 = vpack.c.bf16 %v1006_v53, %v1005_v50  ;;  %v1615_v61 = vadd.f32 %v1614_v57, %v1613_v55  ;;  %v1663_v62 = vadd.f32 %v1662_v58, %v1661_v56  ;;  %v1616_v0 = vpop.f32.mrb[26].mxu0  ;;  %v1664_v1 = vpop.f32.mrb[26].mxu1 }
 0x182   : > { %v1534_v60 = vpack.c.bf16 %v1022_v54, %v1021_v52  ;;  %v1617_v2 = vpop.f32.mrb[27].mxu0  ;;  %v1665_v3 = vpop.f32.mrb[27].mxu1 }
 0x183   : > { %1550 = vst [vmem:[%s2228_s22 + $0x28] sm:$0xff] %v1494_v59   ;;  %v968_v4 = vmul.f32 %v1615_v61, %v2212_v51  ;;  %v984_v5 = vmul.f32 %v1663_v62, %v2212_v51  ;;  %v1618_v6 = vadd.f32 %v1617_v2, %v1616_v0  ;;  %v1666_v7 = vadd.f32 %v1665_v3, %v1664_v1 }
 0x184   : > { %1558 = vst [vmem:[%s2228_s22 + $0x68] sm:$0xff] %v1534_v60  }
 0x185   : > { %v969_v8 = vmul.f32 %v1618_v6, %v2212_v51  ;;  %v985_v9 = vmul.f32 %v1666_v7, %v2212_v51  ;;  %v1007_v10 = vadd.f32 %v2219_v63, %v968_v4  ;;  %v1023_v11 = vadd.f32 %v2219_v63, %v984_v5 }
 0x187   : > { %v1008_v12 = vadd.f32 %v2219_v63, %v969_v8  ;;  %v1024_v13 = vadd.f32 %v2219_v63, %v985_v9  ;;  %v1619_v14 = vpop.f32.mrb[28].mxu0  ;;  %v1667_v15 = vpop.f32.mrb[28].mxu1 }
 0x188   : > { %v1620_v16 = vpop.f32.mrb[29].mxu0  ;;  %v1668_v17 = vpop.f32.mrb[29].mxu1 }
 0x189   : > { %v1499_v18 = vpack.c.bf16 %v1008_v12, %v1007_v10  ;;  %v1539_v19 = vpack.c.bf16 %v1024_v13, %v1023_v11  ;;  %v1621_v20 = vadd.f32 %v1620_v16, %v1619_v14  ;;  %v1669_v21 = vadd.f32 %v1668_v17, %v1667_v15  ;;  %v1622_v22 = vpop.f32.mrb[30].mxu0  ;;  %v1670_v23 = vpop.f32.mrb[30].mxu1 }
 0x18a   : > { %v1623_v24 = vpop.f32.mrb[31].mxu0  ;;  %v1671_v25 = vpop.f32.mrb[31].mxu1 }
 0x18b   : > { %1551 = vst [vmem:[%s2228_s22 + $0x30] sm:$0xff] %v1499_v18   ;;  %1559 = vst [vmem:[%s2228_s22 + $0x70] sm:$0xff] %v1539_v19   ;;  %v970_v26 = vmul.f32 %v1621_v20, %v2212_v51  ;;  %v986_v27 = vmul.f32 %v1669_v21, %v2212_v51  ;;  %v1624_v28 = vadd.f32 %v1623_v24, %v1622_v22 }
 0x18c   : > { %v1672_v29 = vadd.f32 %v1671_v25, %v1670_v23 }
 0x18d   : > { %v971_v30 = vmul.f32 %v1624_v28, %v2212_v51  ;;  %v1009_v32 = vadd.f32 %v2219_v63, %v970_v26  ;;  %v1025_v33 = vadd.f32 %v2219_v63, %v986_v27 }
 0x18e   : > { %v987_v31 = vmul.f32 %v1672_v29, %v2212_v51 }
 0x18f   : > { %v1010_v34 = vadd.f32 %v2219_v63, %v971_v30 }
 0x190   : > { %v1026_v35 = vadd.f32 %v2219_v63, %v987_v31 }
 0x191   : > { %v1504_v51 = vpack.c.bf16 %v1010_v34, %v1009_v32 }
 0x192   : > { %v1544_v36 = vpack.c.bf16 %v1026_v35, %v1025_v33 }
 0x193   : > { %1552 = vst [vmem:[%s2228_s22 + $0x38] sm:$0xff] %v1504_v51  }
 0x194   : > { %1560 = vst [vmem:[%s2228_s22 + $0x78] sm:$0xff] %v1544_v36  }
 0x195   : > { %1903 = shalt.err (!%p1900_p5)
}
 0x196   : > { %s1904_s23 = scalar_lea.hbm %s2305_s6, 2048  ;;  %s1908_s14 = scalar_lea.hbm %s2361_s4, 16384 }
 0x197   : > { %p1905_p9 = scmp.ne.s32.totalorder %s2305_s6, %s1904_s23  ;;  %p1909_p3 = scmp.lt.u32.totalorder %s2305_s6, %s2361_s4 }
 0x198   : > { %p1910_p7 = scmp.lt.u32.totalorder %s1908_s14, %s1904_s23  ;;  %p1912_p4 = scmp.lt.u32.totalorder %s1904_s23, %s2305_s6 }
 0x199   : > { %p1906_p1 = pnand %p1905_p9, %p2107_p11 }
 0x19a   : > { %p1911_p13 = por %p1910_p7, %p1909_p3 }
 0x19b   : > { %p1907_p2 = pneg %p1906_p1 }
 0x19c   : > { %p1913_p6 = por %p1912_p4, %p1911_p13 }
 0x19e   : > { %p1914_p8 = pnand %p1913_p6, %p1907_p2 }
 0x1a0   : > { %1917 = shalt.err (!%p1914_p8)
}
 0x1a1   : > { %s1985_s28 = smov 64   ;;  %s1986_s24 = smov 4  }
 0x1a2   : > { %1695 = dma.vmem_to_hbm [thread:$0]  (%p2107_p11), %s2307_s13, 2048, %s2305_s6, %s1188_s18, %s1985_s28, %s1985_s28, %s1986_s24  }
 0x1a3 PF: > { %p1712_p12 = scmp.ge.s32.totalorder %s1976_s20, 2  ;;  %s1217_s30 = sand.u32 1, %s1956_s15  }
 0x1a4   : > { %p2379_p10 = scmp.ne.s32.totalorder %s2369_s26, 0  ;;  %s1218_s9 = scalar_lea.sflag [#allocation5], %s1217_s30 }
 0x1a6   : > { %p1706_p0 = pnand %p1712_p12, %p2379_p10 }
 0x1a8   : > { %1951 = dma.done.wait (!%p1706_p0), %s1218_s9, 2048  }
 0x1a9   : > { %1953 = vsyncadd (!%p1706_p0), %s1218_s9, 4294965248  ;;  %s21_s20 = sadd.s32 1, %s1976_s20   ;;  %s2380_s15 = smov %s1960_s16 }
 0x1aa   : > { %p18_p5 = scmp.ge.s32.totalorder %s21_s20, 10   ;;  %s2381_s16 = smov %s1964_s17 }
 0x1ab   : > { %s2382_s17 = smov %s2116_s10  ;;  %s2383_s18 = smov %s1972_s19 }
 0x1ac   : > { %s2384_s19 = smov %s2386_s5  ;;  %20 = sbr.rel (!%p18_p5) target bundleno = 7 (0x7), region = 100 }
 0x1b3   :  { %1223 = vsyncpa [#allocation4], 1 }
 0x1b4   :  { %1225 = vsyncpa [#allocation4 + $0x1], 1 }
 0x1b5   :  { %1226 = vsyncpa [#allocation7], 1 }
 0x1b6   :  { %1227 = vsyncpa [#allocation5], 1 }
 0x1b7   :  { %1229 = vsyncpa [#allocation5 + $0x1], 1 }

</bundles_post_ra>
